<compile_context>
chip_gen: v7x
topology: tpu7x:2x2x1
jax: 0.10.0
libtpu: 0.0.40
codegen_flags: <defaults>
</compile_context>

<pallas_src>
import functools
import math

import jax
import jax.numpy as jnp
from jax.experimental import pallas as pl
from jax.experimental.pallas import tpu as pltpu

IN_DIM = 93
H1, H2, H3, OUT_DIM = 64, 32, 16, 9

_MAX_TILE = 4096   # rows per grid step for large batches
_MIN_TILE = 8      # keep block_b a multiple of 8 (sublane constraint)
_VMEM_LIMIT = 32 * 1024 * 1024


def _mlp_kernel(x_ref, w1_ref, b1_ref, w2_ref, b2_ref,
                w3_ref, b3_ref, w4_ref, b4_ref, o_ref):
    """Fused 4-layer MLP on one batch tile. All dots accumulate in f32."""
    x = x_ref[...]
    if x.dtype != jnp.float32:
        x = x.astype(jnp.float32)   # in-kernel cast hides under the input DMA
    h = jnp.dot(x, w1_ref[...], preferred_element_type=jnp.float32) + b1_ref[...]
    h = jnp.maximum(h, 0.0)
    h = jnp.dot(h, w2_ref[...], preferred_element_type=jnp.float32) + b2_ref[...]
    h = jnp.maximum(h, 0.0)
    h = jnp.dot(h, w3_ref[...], preferred_element_type=jnp.float32) + b3_ref[...]
    h = jnp.maximum(h, 0.0)
    out = jnp.dot(h, w4_ref[...], preferred_element_type=jnp.float32) + b4_ref[...]
    o_ref[...] = out.astype(o_ref.dtype)


@functools.partial(jax.jit, static_argnames=("block_b",))
def _net_forward_impl(x, params, block_b):
    w1, b1, w2, b2, w3, b3, w4, b4 = params

    # Flatten to (-1, 93); no pad, no cast -- the ragged final block is
    # handled by Pallas (masked writes on the partial output tile).
    x2 = x.reshape(-1, IN_DIM)
    batch = x2.shape[0]
    grid = (pl.cdiv(batch, block_b),)

    # Advisory cost estimate (memory-bound custom call) for XLA's scheduler.
    n_weights = IN_DIM * H1 + H1 * H2 + H2 * H3 + H3 * OUT_DIM
    n_bias = H1 + H2 + H3 + OUT_DIM
    in_bytes = x2.dtype.itemsize
    flops = 2 * batch * n_weights
    bytes_accessed = (batch * (IN_DIM * in_bytes + OUT_DIM * 4)
                      + 4 * (n_weights + n_bias))

    out = pl.pallas_call(
        _mlp_kernel,
        out_shape=jax.ShapeDtypeStruct((batch, OUT_DIM), jnp.float32),
        grid_spec=pltpu.PrefetchScalarGridSpec(
            num_scalar_prefetch=0,
            grid=grid,
            in_specs=[
                pl.BlockSpec((block_b, IN_DIM), lambda i: (i, 0)),
                pl.BlockSpec((IN_DIM, H1), lambda i: (0, 0)),
                pl.BlockSpec((1, H1), lambda i: (0, 0)),
                pl.BlockSpec((H1, H2), lambda i: (0, 0)),
                pl.BlockSpec((1, H2), lambda i: (0, 0)),
                pl.BlockSpec((H2, H3), lambda i: (0, 0)),
                pl.BlockSpec((1, H3), lambda i: (0, 0)),
                pl.BlockSpec((H3, OUT_DIM), lambda i: (0, 0)),
                pl.BlockSpec((1, OUT_DIM), lambda i: (0, 0)),
            ],
            out_specs=pl.BlockSpec((block_b, OUT_DIM), lambda i: (i, 0)),
        ),
        compiler_params=pltpu.CompilerParams(
            dimension_semantics=("parallel",),
            vmem_limit_bytes=_VMEM_LIMIT,
        ),
        cost_estimate=pl.CostEstimate(
            flops=flops, transcendentals=0, bytes_accessed=bytes_accessed),
    )(x2, w1, b1, w2, b2, w3, b3, w4, b4)

    return out


def net_forward(x, params, block_b=None):
    """Forward pass. `x` may have any leading shape; it is flattened to (-1, 93).

    block_b: large batches use a 4096-row tile (amortizes the ~0.35 us per-step
    pipeline overhead toward the HBM roofline, keeps a multi-step "parallel"
    grid for v7x's 2 TensorCores); small batches bucket to the next power of
    two >= 8 so distinct batch sizes reuse compiled kernels.
    """
    total = math.prod(x.shape)
    batch = total // IN_DIM
    if block_b is None:
        block_b = min(_MAX_TILE, max(_MIN_TILE, pl.next_power_of_2(max(batch, 1))))
    return _net_forward_impl(x, params, block_b)


def init_params(key):
    """Deterministic init mimicking PyTorch nn.Linear (uniform +-1/sqrt(fan_in)).

    Weights stored as f32 (in, out); biases as f32 (1, out).
    """
    dims = [(IN_DIM, H1), (H1, H2), (H2, H3), (H3, OUT_DIM)]
    params = []
    for (fan_in, fan_out) in dims:
        key, kw, kb = jax.random.split(key, 3)
        bound = 1.0 / jnp.sqrt(jnp.float32(fan_in))
        w = jax.random.uniform(kw, (fan_in, fan_out), jnp.float32, -bound, bound)
        b = jax.random.uniform(kb, (1, fan_out), jnp.float32, -bound, bound)
        params.extend([w, b])
    return tuple(params)


def _reference(x, params):
    """Pure-f32 jnp reference of the PyTorch forward."""
    w1, b1, w2, b2, w3, b3, w4, b4 = params
    h = x.reshape(-1, IN_DIM).astype(jnp.float32)
    h = jnp.maximum(h @ w1 + b1, 0.0)
    h = jnp.maximum(h @ w2 + b2, 0.0)
    h = jnp.maximum(h @ w3 + b3, 0.0)
    return h @ w4 + b4


if __name__ == "__main__":
    key = jax.random.PRNGKey(0)
    kp, kx1, kx2 = jax.random.split(key, 3)
    params = init_params(kp)

    # Small case with a non-trivial leading shape: (2, 4, 93) -> flattens to
    # batch=8, single grid step, block_b=8.
    x_small = jax.random.normal(kx1, (2, 4, IN_DIM), jnp.float32)
    out_small = jax.block_until_ready(net_forward(x_small, params))
    ref_small = _reference(x_small, params)
    assert out_small.shape == (8, OUT_DIM)
    assert jnp.allclose(out_small, ref_small, atol=2e-2, rtol=2e-2), \
        "small-batch mismatch vs reference"

    # Ragged case: batch=20 buckets to block_b=32, exercising the partial
    # (masked) final block with no wrapper pad/slice.
    x_ragged = jax.random.normal(kx2, (20, IN_DIM), jnp.float32)
    out_ragged = jax.block_until_ready(net_forward(x_ragged, params))
    ref_ragged = _reference(x_ragged, params)
    assert out_ragged.shape == (20, OUT_DIM)
    assert jnp.allclose(out_ragged, ref_ragged, atol=2e-2, rtol=2e-2), \
        "ragged-batch mismatch vs reference"

    print("KERNEL_OK")
</pallas_src>

<mosaic_0001>
module attributes {stable_mosaic.version = 11 : i64} {
  func.func @_mlp_kernel(%arg0: i32, %arg1: memref<8x93xf32, #tpu.memory_space<vmem>>, %arg2: memref<93x64xf32, #tpu.memory_space<vmem>>, %arg3: memref<1x64xf32, #tpu.memory_space<vmem>>, %arg4: memref<64x32xf32, #tpu.memory_space<vmem>>, %arg5: memref<1x32xf32, #tpu.memory_space<vmem>>, %arg6: memref<32x16xf32, #tpu.memory_space<vmem>>, %arg7: memref<1x16xf32, #tpu.memory_space<vmem>>, %arg8: memref<16x9xf32, #tpu.memory_space<vmem>>, %arg9: memref<1x9xf32, #tpu.memory_space<vmem>>, %arg10: memref<8x9xf32, #tpu.memory_space<vmem>>) attributes {dimension_semantics = [#tpu.dimension_semantics<parallel>], iteration_bounds = array<i64: 1>, scalar_prefetch = 0 : i64, scratch_operands = 0 : i64, tpu.core_type = #tpu.core_type<tc>, window_params = [{transform_indices = @transform_0, window_bounds = array<i64: 8, 93>}, {pipeline_mode = #tpu.pipeline_mode<synchronous>, transform_indices = @transform_1, window_bounds = array<i64: 93, 64>}, {pipeline_mode = #tpu.pipeline_mode<synchronous>, transform_indices = @transform_2, window_bounds = array<i64: 1, 64>}, {pipeline_mode = #tpu.pipeline_mode<synchronous>, transform_indices = @transform_3, window_bounds = array<i64: 64, 32>}, {pipeline_mode = #tpu.pipeline_mode<synchronous>, transform_indices = @transform_4, window_bounds = array<i64: 1, 32>}, {pipeline_mode = #tpu.pipeline_mode<synchronous>, transform_indices = @transform_5, window_bounds = array<i64: 32, 16>}, {pipeline_mode = #tpu.pipeline_mode<synchronous>, transform_indices = @transform_6, window_bounds = array<i64: 1, 16>}, {pipeline_mode = #tpu.pipeline_mode<synchronous>, transform_indices = @transform_7, window_bounds = array<i64: 16, 9>}, {pipeline_mode = #tpu.pipeline_mode<synchronous>, transform_indices = @transform_8, window_bounds = array<i64: 1, 9>}, {transform_indices = @transform_9, window_bounds = array<i64: 8, 9>}]} {
    %c0 = arith.constant 0 : index
    %c0_0 = arith.constant 0 : index
    %0 = vector.load %arg1[%c0, %c0_0] : memref<8x93xf32, #tpu.memory_space<vmem>>, vector<8x93xf32>
    %c0_1 = arith.constant 0 : index
    %c0_2 = arith.constant 0 : index
    %1 = vector.load %arg2[%c0_1, %c0_2] : memref<93x64xf32, #tpu.memory_space<vmem>>, vector<93x64xf32>
    %cst = arith.constant dense<0.000000e+00> : vector<8x64xf32>
    %2 = tpu.matmul %0, %1, %cst {dimension_numbers = #tpu.dot_dimension_numbers<[1], [0], [0], [1], [0, 0, 1, 1], [], []>} : vector<8x93xf32>, vector<93x64xf32>, vector<8x64xf32> -> vector<8x64xf32>
    %c0_3 = arith.constant 0 : index
    %c0_4 = arith.constant 0 : index
    %3 = vector.load %arg3[%c0_3, %c0_4] : memref<1x64xf32, #tpu.memory_space<vmem>>, vector<1x64xf32>
    %4 = vector.broadcast %3 : vector<1x64xf32> to vector<8x64xf32>
    %5 = arith.addf %2, %4 : vector<8x64xf32>
    %cst_5 = arith.constant 0.000000e+00 : f32
    %6 = vector.broadcast %cst_5 : f32 to vector<8x64xf32>
    %7 = arith.maximumf %5, %6 : vector<8x64xf32>
    %c0_6 = arith.constant 0 : index
    %c0_7 = arith.constant 0 : index
    %8 = vector.load %arg4[%c0_6, %c0_7] : memref<64x32xf32, #tpu.memory_space<vmem>>, vector<64x32xf32>
    %cst_8 = arith.constant dense<0.000000e+00> : vector<8x32xf32>
    %9 = tpu.matmul %7, %8, %cst_8 {dimension_numbers = #tpu.dot_dimension_numbers<[1], [0], [0], [1], [0, 0, 1, 1], [], []>} : vector<8x64xf32>, vector<64x32xf32>, vector<8x32xf32> -> vector<8x32xf32>
    %c0_9 = arith.constant 0 : index
    %c0_10 = arith.constant 0 : index
    %10 = vector.load %arg5[%c0_9, %c0_10] : memref<1x32xf32, #tpu.memory_space<vmem>>, vector<1x32xf32>
    %11 = vector.broadcast %10 : vector<1x32xf32> to vector<8x32xf32>
    %12 = arith.addf %9, %11 : vector<8x32xf32>
    %cst_11 = arith.constant 0.000000e+00 : f32
    %13 = vector.broadcast %cst_11 : f32 to vector<8x32xf32>
    %14 = arith.maximumf %12, %13 : vector<8x32xf32>
    %c0_12 = arith.constant 0 : index
    %c0_13 = arith.constant 0 : index
    %15 = vector.load %arg6[%c0_12, %c0_13] : memref<32x16xf32, #tpu.memory_space<vmem>>, vector<32x16xf32>
    %cst_14 = arith.constant dense<0.000000e+00> : vector<8x16xf32>
    %16 = tpu.matmul %14, %15, %cst_14 {dimension_numbers = #tpu.dot_dimension_numbers<[1], [0], [0], [1], [0, 0, 1, 1], [], []>} : vector<8x32xf32>, vector<32x16xf32>, vector<8x16xf32> -> vector<8x16xf32>
    %c0_15 = arith.constant 0 : index
    %c0_16 = arith.constant 0 : index
    %17 = vector.load %arg7[%c0_15, %c0_16] : memref<1x16xf32, #tpu.memory_space<vmem>>, vector<1x16xf32>
    %18 = vector.broadcast %17 : vector<1x16xf32> to vector<8x16xf32>
    %19 = arith.addf %16, %18 : vector<8x16xf32>
    %cst_17 = arith.constant 0.000000e+00 : f32
    %20 = vector.broadcast %cst_17 : f32 to vector<8x16xf32>
    %21 = arith.maximumf %19, %20 : vector<8x16xf32>
    %c0_18 = arith.constant 0 : index
    %c0_19 = arith.constant 0 : index
    %22 = vector.load %arg8[%c0_18, %c0_19] : memref<16x9xf32, #tpu.memory_space<vmem>>, vector<16x9xf32>
    %cst_20 = arith.constant dense<0.000000e+00> : vector<8x9xf32>
    %23 = tpu.matmul %21, %22, %cst_20 {dimension_numbers = #tpu.dot_dimension_numbers<[1], [0], [0], [1], [0, 0, 1, 1], [], []>} : vector<8x16xf32>, vector<16x9xf32>, vector<8x9xf32> -> vector<8x9xf32>
    %c0_21 = arith.constant 0 : index
    %c0_22 = arith.constant 0 : index
    %24 = vector.load %arg9[%c0_21, %c0_22] : memref<1x9xf32, #tpu.memory_space<vmem>>, vector<1x9xf32>
    %25 = vector.broadcast %24 : vector<1x9xf32> to vector<8x9xf32>
    %26 = arith.addf %23, %25 : vector<8x9xf32>
    %c0_23 = arith.constant 0 : index
    %c0_24 = arith.constant 0 : index
    %27 = vector.load %arg10[%c0_23, %c0_24] : memref<8x9xf32, #tpu.memory_space<vmem>>, vector<8x9xf32>
    tpu.vector_store %arg10[%c0_23, %c0_24], %26 {strides = array<i32>} : memref<8x9xf32, #tpu.memory_space<vmem>>, vector<8x9xf32>,
    return
  }
  func.func @transform_0(%arg0: i32) -> (i32, i32) {
    %c0_i32 = arith.constant 0 : i32
    %c0_i32_0 = arith.constant 0 : i32
    return %arg0, %c0_i32 : i32, i32
  }
  func.func @transform_1(%arg0: i32) -> (i32, i32) {
    %c0_i32 = arith.constant 0 : i32
    %c0_i32_0 = arith.constant 0 : i32
    %c0_i32_1 = arith.constant 0 : i32
    return %c0_i32, %c0_i32_0 : i32, i32
  }
  func.func @transform_2(%arg0: i32) -> (i32, i32) {
    %c0_i32 = arith.constant 0 : i32
    %c0_i32_0 = arith.constant 0 : i32
    %c0_i32_1 = arith.constant 0 : i32
    return %c0_i32, %c0_i32_0 : i32, i32
  }
  func.func @transform_3(%arg0: i32) -> (i32, i32) {
    %c0_i32 = arith.constant 0 : i32
    %c0_i32_0 = arith.constant 0 : i32
    %c0_i32_1 = arith.constant 0 : i32
    return %c0_i32, %c0_i32_0 : i32, i32
  }
  func.func @transform_4(%arg0: i32) -> (i32, i32) {
    %c0_i32 = arith.constant 0 : i32
    %c0_i32_0 = arith.constant 0 : i32
    %c0_i32_1 = arith.constant 0 : i32
    return %c0_i32, %c0_i32_0 : i32, i32
  }
  func.func @transform_5(%arg0: i32) -> (i32, i32) {
    %c0_i32 = arith.constant 0 : i32
    %c0_i32_0 = arith.constant 0 : i32
    %c0_i32_1 = arith.constant 0 : i32
    return %c0_i32, %c0_i32_0 : i32, i32
  }
  func.func @transform_6(%arg0: i32) -> (i32, i32) {
    %c0_i32 = arith.constant 0 : i32
    %c0_i32_0 = arith.constant 0 : i32
    %c0_i32_1 = arith.constant 0 : i32
    return %c0_i32, %c0_i32_0 : i32, i32
  }
  func.func @transform_7(%arg0: i32) -> (i32, i32) {
    %c0_i32 = arith.constant 0 : i32
    %c0_i32_0 = arith.constant 0 : i32
    %c0_i32_1 = arith.constant 0 : i32
    return %c0_i32, %c0_i32_0 : i32, i32
  }
  func.func @transform_8(%arg0: i32) -> (i32, i32) {
    %c0_i32 = arith.constant 0 : i32
    %c0_i32_0 = arith.constant 0 : i32
    %c0_i32_1 = arith.constant 0 : i32
    return %c0_i32, %c0_i32_0 : i32, i32
  }
  func.func @transform_9(%arg0: i32) -> (i32, i32) {
    %c0_i32 = arith.constant 0 : i32
    %c0_i32_0 = arith.constant 0 : i32
    return %arg0, %c0_i32 : i32, i32
  }
}

</mosaic_0001>

<bundles_post_ra>
// kernel: _net_forward_impl.1
= control target key start
LH: loop header
LB: loop body
LE: loop exit
PB: predicated region body
PF: predicated region fallthrough
CT: control target
= control target key end

     0   :  { %v579_v3 = vmov 0.0|0.0   ;;  %vm580_vm0 = vmmov 0   ;;  %v581_v6 = vmov 0.0   ;;  %s760_s0 = inlined_call_operand.vmem [shape: f32[8,93], index: 0, kind: input, shape index: {}]   ;;  %s761_s1 = inlined_call_operand.vmem [shape: f32[93,64], index: 1, kind: input, shape index: {}]   ;;  %s762_s2 = inlined_call_operand.vmem [shape: f32[1,64], index: 2, kind: input, shape index: {}]   ;;  %s763_s3 = inlined_call_operand.vmem [shape: f32[64,32], index: 3, kind: input, shape index: {}]   ;;  %s764_s4 = inlined_call_operand.vmem [shape: f32[1,32], index: 4, kind: input, shape index: {}]   ;;  %s765_s5 = inlined_call_operand.vmem [shape: f32[32,16], index: 5, kind: input, shape index: {}]   ;;  %s766_s6 = inlined_call_operand.vmem [shape: f32[1,16], index: 6, kind: input, shape index: {}]   ;;  %s767_s7 = inlined_call_operand.vmem [shape: f32[16,9], index: 7, kind: input, shape index: {}]   ;;  %s768_s8 = inlined_call_operand.vmem [shape: f32[1,9], index: 8, kind: input, shape index: {}]   ;;  %s769_s9 = inlined_call_operand.hbm [shape: f32[8,9], index: 9, kind: output, shape index: {}]  }
   0x1   :  { %v34_v0 = vld [vmem:[%s761_s1] sm:$0xff]  ;;  %v35_v1 = vld [vmem:[%s761_s1 + $0x8] sm:$0xff]  ;;  %v36_v2 = vld [vmem:[%s761_s1 + $0x10] sm:$0xff]  ;;  %510 = vmatprep.subr.bf16.mxu0 %v579_v3  ;;  %529 = vmatprep.subr.bf16.mxu1 %v579_v3 }
   0x2   :  { %v511_v4 = vpack.c.bf16 %v35_v1, %v34_v0  ;;  %v37_v5 = vld [vmem:[%s761_s1 + $0x18] sm:$0xff]  ;;  %470 = vmatprep.mubr.msk.f32.mxu0 %vm580_vm0, %v581_v6  ;;  %489 = vmatprep.mubr.msk.f32.mxu1 %vm580_vm0, %v581_v6  ;;  %v38_v8 = vld [vmem:[%s761_s1 + $0x20] sm:$0xff]  ;;  %v39_v9 = vld [vmem:[%s761_s1 + $0x28] sm:$0xff] }
   0x3   :  { %v514_v7 = vpack.c.bf16 %v37_v5, %v36_v2  ;;  %v132_v10 = vld [vmem:[%s763_s3] sm:$0xff]  ;;  %v133_v11 = vld [vmem:[%s763_s3 + $0x8] sm:$0xff]  ;;  %v134_v12 = vld [vmem:[%s763_s3 + $0x10] sm:$0xff]  ;;  %v517_v15 = vpack.c.bf16 %v39_v9, %v38_v8 }
   0x4   :  { %512 = vmatpush3.bf16.msra.mxu0 %v511_v4  ;;  %v135_v13 = vld [vmem:[%s763_s3 + $0x18] sm:$0xff]  ;;  %v530_v14 = vpack.c.bf16 %v133_v11, %v132_v10 }
   0x5   :  { %513 = vmatprep.subr.bf16.mxu0 %v579_v3 }
   0x8   :  { %515 = vmatpush3.bf16.msra.mxu0 %v514_v7 }
   0x9   :  { %14 = vsyncpa [#allocation3], 0  ;;  %516 = vmatprep.subr.bf16.mxu0 %v579_v3  ;;  %v40_v16 = vld [vmem:[%s761_s1 + $0x30] sm:$0xff]  ;;  %v41_v17 = vld [vmem:[%s761_s1 + $0x38] sm:$0xff]  ;;  %531 = vmatpush3.bf16.msra.mxu1 %v530_v14  ;;  %v533_v18 = vpack.c.bf16 %v135_v13, %v134_v12  ;;  %vm57_vm1 = vcmask 1044480   ;;  %vm582_vm2 = vmmov 1  }
   0xa   :  { %532 = vmatprep.subr.bf16.mxu1 %v579_v3  ;;  %v136_v19 = vld [vmem:[%s763_s3 + $0x20] sm:$0xff]  ;;  %v137_v20 = vld [vmem:[%s763_s3 + $0x28] sm:$0xff]  ;;  %v520_v21 = vpack.c.bf16 %v41_v17, %v40_v16  ;;  %v44_v26 = vld [vmem:[%s761_s1 + $0x50] sm:$0xff]  ;;  %vm53_vm4 = vcmask 760832   ;;  %vm147_vm5 = vcmask 523264   ;;  %vm233_vm6 = vcmask 261120  }
   0xb   :  { %v42_v22 = vld [vmem:[%s761_s1 + $0x40] sm:$0xff]  ;;  %v43_v23 = vld [vmem:[%s761_s1 + $0x48] sm:$0xff]  ;;  %v536_v24 = vpack.c.bf16 %v137_v20, %v136_v19  ;;  %v45_v27 = vld [vmem:[%s761_s1 + $0x58] sm:$0x1f]  ;;  %vm317_vm7 = vcmask 130048   ;;  %s583_s23 = smov [#allocation2]  }
   0xc   :  { %518 = vmatpush3.bf16.msra.mxu0 %v517_v15  ;;  %v523_v25 = vpack.c.bf16 %v43_v23, %v42_v22  ;;  %v526_v28 = vpack.c.bf16 %v45_v27, %v44_v26  ;;  %vm527_vm3 = vmpackc.low %vm57_vm1, %vm582_vm2  ;;  %v33_v29 = vld [vmem:[%s760_s0] sm:$0xff]  ;;  %v138_v30 = vld [vmem:[%s763_s3 + $0x30] sm:$0xff]  ;;  %s399_s24 = sshll.u32 %s583_s23, 4  ;;  %vm391_vm8 = vcmask 72704   ;;  %s400_s24 = int_to_ptr.vmem [resolvable:$true] %s399_s24 }
   0xd   :  { %519 = vmatprep.subr.bf16.mxu0 %v579_v3  ;;  %534 = vmatpush3.bf16.msra.mxu1 %v533_v18  ;;  %v139_v31 = vld [vmem:[%s763_s3 + $0x38] sm:$0xff]  ;;  %v407_v33 = vld [vmem:[%s762_s2] ss:$0 sm:$0xff]  ;;  %v223_v35 = vld [vmem:[%s765_s5 + $0x8] sm:$0xff]  ;;  %p560_p1 = scmp.lt.s32.totalorder %s400_s24, %s400_s24 }
   0xe   :  { %535 = vmatprep.subr.bf16.mxu1 %v579_v3  ;;  %v539_v32 = vpack.c.bf16 %v139_v31, %v138_v30  ;;  %v222_v34 = vld [vmem:[%s765_s5] sm:$0xff]  ;;  %v224_v41 = vld [vmem:[%s765_s5 + $0x10] sm:$0xff]  ;;  %v225_v42 = vld [vmem:[%s765_s5 + $0x18] sm:$0xff] }
   0xf   :  { %v542_v39 = vpack.c.bf16 %v223_v35, %v222_v34  ;;  %v545_v43 = vpack.c.bf16 %v225_v42, %v224_v41  ;;  %v410_v44 = vld [vmem:[%s764_s4] ss:$0 sm:$0xff]  ;;  %v309_v50 = vld [vmem:[%s767_s7 + $0x8] sm:$0xff] }
  0x10   :  { %521 = vmatpush3.bf16.msra.mxu0 %v520_v21  ;;  %v308_v49 = vld [vmem:[%s767_s7] sm:$0xff]  ;;  %s555_s7 = scalar_lea.vmem %s400_s24, 128 }
  0x11   :  { %522 = vmatprep.subr.bf16.mxu0 %v579_v3  ;;  %537 = vmatpush3.bf16.msra.mxu1 %v536_v24  ;;  %v548_v51 = vpack.c.bf16 %v309_v50, %v308_v49  ;;  %v412_v52 = vld [vmem:[%s766_s6] ss:$0 sm:$0xff]  ;;  %p556_p0 = scmp.ne.s32.totalorder %s400_s24, %s555_s7  ;;  %p561_p2 = scmp.lt.s32.totalorder %s555_s7, %s555_s7 }
  0x12   :  { %538 = vmatprep.subr.bf16.mxu1 %v579_v3  ;;  %v414_v57 = vld [vmem:[%s768_s8] ss:$0 sm:$0xff] }
  0x13   :  { %p562_p3 = por %p561_p2, %p560_p1 }
  0x14   :  { %524 = vmatpush3.bf16.msra.mxu0 %v523_v25 }
  0x15   :  { %525 = vmatprep.subr.bf16.mxu0 %v579_v3  ;;  %540 = vmatpush3.bf16.msra.mxu1 %v539_v32  ;;  %p563_p4 = pnand %p562_p3, %p556_p0 }
  0x16   :  { %541 = vmatprep.subr.bf16.mxu1 %v579_v3 }
  0x18   :  { %528 = vmatpush3.bf16.msk.msra.mxu0 %vm527_vm3, %v526_v28 }
  0x19   :  { %547 = vmatprep.subr.bf16.mxu0 %v579_v3 }
  0x1b   :  { %471 = vmatmul.mubr.msk.f32.vlgmr.msra.gmra.mrb[0].mxu0 %vm53_vm4, %v33_v29 }
  0x1c   :  { %507 = vmatprep.mubr.msk.f32.mxu0 %vm580_vm0, %v581_v6  ;;  %549 = vmatpush3.bf16.msra.mxu0 %v548_v51 }
  0xee   :  { %v127_v36 = vpop.f32.mrb[0].mxu0 }
  0xef   :  { %v128_v37 = vadd.f32 %v407_v33, %v127_v36  ;;  %v472_v38 = vpop.f32.mrb[1].mxu0 }
  0xf1   :  { %v131_v40 = vmax.f32 %v128_v37, 0.0 }
  0xf3   :  { %490 = vmatmul.mubr.msk.f32.vlgmr.msra.gmra.mrb[0].mxu1 %vm147_vm5, %v131_v40 }
  0xf4   :  { %543 = vmatpush3.bf16.msra.mxu1 %v542_v39  ;;  %500 = vmatprep.mubr.msk.f32.mxu1 %vm580_vm0, %v581_v6 }
  0xf5   :  { %544 = vmatprep.subr.bf16.mxu1 %v579_v3 }
  0xf8   :  { %546 = vmatpush3.bf16.msra.mxu1 %v545_v43 }
 0x1c6   :  { %v217_v45 = vpop.f32.mrb[0].mxu1 }
 0x1c7   :  { %v218_v46 = vadd.f32 %v410_v44, %v217_v45  ;;  %v491_v47 = vpop.f32.mrb[1].mxu1 }
 0x1c9   :  { %v221_v48 = vmax.f32 %v218_v46, 0.0 }
 0x1cb   :  { %501 = vmatmul.mubr.msk.f32.vlgmr.msra.gmra.mrb[2].mxu1 %vm233_vm6, %v221_v48 }
 0x29e   :  { %v303_v53 = vpop.f32.mrb[2].mxu1 }
 0x29f   :  { %v304_v54 = vadd.f32 %v412_v52, %v303_v53  ;;  %v502_v55 = vpop.f32.mrb[3].mxu1 }
 0x2a1   :  { %v307_v56 = vmax.f32 %v304_v54, 0.0 }
 0x2a3   :  { %508 = vmatmul.mubr.msk.f32.vlgmr.msra.gmra.mrb[2].mxu0 %vm317_vm7, %v307_v56 }
 0x376   :  { %v387_v58 = vpop.f32.mrb[2].mxu0 }
 0x377   :  { %v388_v59 = vadd.f32 %v414_v57, %v387_v58  ;;  %v509_v60 = vpop.f32.mrb[3].mxu0 }
 0x379   :  { %392 = vst.msk [vmem:[#allocation2] sm:$0xff] %vm391_vm8, %v388_v59 }
 0x37a   :  { %566 = shalt.err (!%p563_p4)
}
 0x37b   :  { %s567_s1 = scalar_lea.hbm %s769_s9, 128 }
 0x37c   :  { %p568_p5 = scmp.ne.s32.totalorder %s769_s9, %s567_s1  ;;  %p571_p6 = scmp.lt.u32.totalorder %s567_s1, %s769_s9 }
 0x37e   :  { %p573_p7 = pnand %p571_p6, %p568_p5 }
 0x380   :  { %576 = shalt.err (!%p573_p7)
}
 0x381   :  { %402 = dma.vmem_to_hbm [thread:$0]  %s400_s24, 128, %s769_s9, [#allocation3]  }
 0x382   :  { %577 = dma.done.wait [#allocation3], 128  }
 0x383   :  { %578 = vsyncadd [#allocation3], 4294967168 }
 0x384   :  { %406 = vsyncpa [#allocation3], 1 }

</bundles_post_ra>
